<compile_context>
chip_gen: v7x
topology: tpu7x:2x2x1
jax: 0.10.0
libtpu: 0.0.40
codegen_flags: <defaults>
</compile_context>

<pallas_src>
import numpy as np
import jax
import jax.numpy as jnp
from jax.experimental import pallas as pl
from jax.experimental.pallas import tpu as pltpu


_VMEM_LIMIT_BYTES = 48 * 1024 * 1024    # safe on v5e/v6e (128 MiB) and v7x (64 MiB per TC)
_TIME_BLOCK_BUDGET = 32 * 1024 * 1024   # VMEM bytes budgeted for the pipelined xp/y blocks
_MAX_UNROLL = 32                        # cap on statically-unrolled timesteps per grid step


def _largest_divisor_leq(n, target):
    t = max(1, min(n, target))
    while n % t:
        t -= 1
    return t


# ---------------------------------------------------------------------------
# Pallas kernels
# ---------------------------------------------------------------------------
def bilstm_seq_kernel(xp_ref, whh_ref, y_ref, h_ref, c_ref):
    """Fused bidirectional LSTM recurrence over a block of TB timesteps.

    Grid: (direction d in {0,1}, time-block).  Direction is outermost and "parallel"
    (v7x megacore); time is the true recurrence and stays "arbitrary".

    xp_ref : (TB, B, 4H) bf16  pre-projected gates (x @ Wih + b) for this direction,
                               gate columns ordered [i, f, o | g]; time blocks are
                               delivered in processing order via the index_map.
    whh_ref: (H, 4H)     bf16  recurrent weights for this direction (block-resident).
    y_ref  : (TB, B, H)  bf16  hidden-state outputs (direction-major slab outside).
    h_ref, c_ref : (B, H) f32  state carried across time blocks (VMEM scratch); only
                               read/written once per block, the per-step carry lives
                               in vregs.
    """
    d = pl.program_id(0)
    tb = pl.program_id(1)

    @pl.when(tb == 0)
    def _():
        h_ref[...] = jnp.zeros_like(h_ref)
        c_ref[...] = jnp.zeros_like(c_ref)

    TB = xp_ref.shape[0]
    H = h_ref.shape[-1]
    whh = whh_ref[...]                                       # (H, 4H) bf16, resident

    def run_block(order):
        h = h_ref[...]                                       # (B, H) f32, kept in vregs
        c = c_ref[...]
        for s in order:                                      # static ints -> immediate addressing
            gates = (xp_ref[s].astype(jnp.float32)
                     + jnp.dot(h.astype(whh.dtype), whh,
                               preferred_element_type=jnp.float32))      # (B, 4H) f32
            # gate layout [i, f, o | g]: one sigmoid over (B, 3H), one tanh over (B, H)
            sig = jax.nn.sigmoid(gates[:, :3 * H])
            i_g = sig[:, 0 * H:1 * H]
            f_g = sig[:, 1 * H:2 * H]
            o_g = sig[:, 2 * H:3 * H]
            g_g = jnp.tanh(gates[:, 3 * H:4 * H])
            c = f_g * c + i_g * g_g
            h = o_g * jnp.tanh(c)
            y_ref[s] = h.astype(y_ref.dtype)
        h_ref[...] = h                                       # flush carries once per block
        c_ref[...] = c

    @pl.when(d == 0)
    def _():
        run_block(range(TB))                                 # forward: 0 .. TB-1

    @pl.when(d == 1)
    def _():
        run_block(range(TB - 1, -1, -1))                     # backward: TB-1 .. 0


def matmul_bias_kernel(x_ref, w_ref, b_ref, o_ref, acc_ref):
    """o = x @ w + b, tiled over (M, N, K) with an f32 VMEM accumulator."""
    @pl.when(pl.program_id(2) == 0)
    def _():
        acc_ref[...] = jnp.zeros_like(acc_ref)
    acc_ref[...] += jnp.dot(x_ref[...], w_ref[...], preferred_element_type=jnp.float32)

    @pl.when(pl.program_id(2) == pl.num_programs(2) - 1)
    def _():
        o_ref[...] = (acc_ref[...] + b_ref[...]).astype(o_ref.dtype)


def dual_matmul_bias_kernel(x_ref, w_ref, b_ref, o_ref, acc_ref):
    """o = x[0] @ w[0] + x[1] @ w[1] + b -- consumes the direction-major LSTM slab
    directly, avoiding a (T, B, 2H) concat copy.  Tiled like matmul_bias_kernel."""
    @pl.when(pl.program_id(2) == 0)
    def _():
        acc_ref[...] = jnp.zeros_like(acc_ref)
    acc = jnp.dot(x_ref[0], w_ref[0], preferred_element_type=jnp.float32)
    acc = acc + jnp.dot(x_ref[1], w_ref[1], preferred_element_type=jnp.float32)
    acc_ref[...] += acc

    @pl.when(pl.program_id(2) == pl.num_programs(2) - 1)
    def _():
        o_ref[...] = (acc_ref[...] + b_ref[...]).astype(o_ref.dtype)


# ---------------------------------------------------------------------------
# Wrappers
# ---------------------------------------------------------------------------
def run_matmul_bias(x, w, b, out_dtype=jnp.float32, tm=512, tn=512, tk=512):
    M, K = x.shape
    N = w.shape[-1]
    tm = _largest_divisor_leq(M, tm)
    tn = _largest_divisor_leq(N, tn)
    tk = _largest_divisor_leq(K, tk)
    return pl.pallas_call(
        matmul_bias_kernel,
        out_shape=jax.ShapeDtypeStruct((M, N), out_dtype),
        grid=(M // tm, N // tn, K // tk),
        in_specs=[pl.BlockSpec((tm, tk), lambda i, j, k: (i, k)),
                  pl.BlockSpec((tk, tn), lambda i, j, k: (k, j)),
                  pl.BlockSpec((1, tn), lambda i, j, k: (0, j))],
        out_specs=pl.BlockSpec((tm, tn), lambda i, j, k: (i, j)),
        scratch_shapes=[pltpu.VMEM((tm, tn), jnp.float32)],
        compiler_params=pltpu.CompilerParams(
            dimension_semantics=("parallel", "parallel", "arbitrary"),
            vmem_limit_bytes=_VMEM_LIMIT_BYTES),
    )(x, w, b)


def run_dual_matmul_bias(x, w, b, out_dtype=jnp.float32, tm=512, tn=512, tk=512):
    # x: (2, M, K), w: (2, K, N), b: (1, N)
    _, M, K = x.shape
    N = w.shape[-1]
    tm = _largest_divisor_leq(M, tm)
    tn = _largest_divisor_leq(N, tn)
    tk = _largest_divisor_leq(K, tk)
    return pl.pallas_call(
        dual_matmul_bias_kernel,
        out_shape=jax.ShapeDtypeStruct((M, N), out_dtype),
        grid=(M // tm, N // tn, K // tk),
        in_specs=[pl.BlockSpec((2, tm, tk), lambda i, j, k: (0, i, k)),
                  pl.BlockSpec((2, tk, tn), lambda i, j, k: (0, k, j)),
                  pl.BlockSpec((1, tn), lambda i, j, k: (0, j))],
        out_specs=pl.BlockSpec((tm, tn), lambda i, j, k: (i, j)),
        scratch_shapes=[pltpu.VMEM((tm, tn), jnp.float32)],
        compiler_params=pltpu.CompilerParams(
            dimension_semantics=("parallel", "parallel", "arbitrary"),
            vmem_limit_bytes=_VMEM_LIMIT_BYTES),
    )(x, w, b)


def _pick_time_block(T, B, H):
    """Largest divisor of T whose double-buffered xp/y blocks fit the VMEM budget,
    capped by the static-unroll limit."""
    per_t = 2 * (B * 4 * H * 2) + 2 * (B * H * 2)        # 2x-buffered bf16 xp + bf16 y per step
    resident = H * 4 * H * 2 + 2 * B * H * 4             # whh (bf16) + h/c scratch (f32)
    avail = max(_TIME_BLOCK_BUDGET - resident, per_t)
    tb_cap = int(max(1, min(_MAX_UNROLL, avail // per_t)))
    return _largest_divisor_leq(T, tb_cap)


def run_bilstm_layer(x_proj, whh):
    """x_proj: (T, B, 8H) bf16 pre-projected gates [fwd 4H | bwd 4H], gate order [i,f,o,g];
       whh   : (2, H, 4H) bf16.  Returns direction-major hidden states (2, T, B, H) bf16."""
    T, B, G2 = x_proj.shape
    H = whh.shape[1]
    assert G2 == 8 * H
    time_block = _pick_time_block(T, B, H)
    nb = T // time_block

    def x_map(d, t):
        # forward reads time blocks 0..nb-1, backward reads nb-1..0;
        # last-axis block index d picks that direction's 4H gate slab.
        return ((1 - d) * t + d * (nb - 1 - t), 0, d)

    def y_map(d, t):
        return (d, (1 - d) * t + d * (nb - 1 - t), 0, 0)

    return pl.pallas_call(
        bilstm_seq_kernel,
        out_shape=jax.ShapeDtypeStruct((2, T, B, H), jnp.bfloat16),
        grid_spec=pltpu.PrefetchScalarGridSpec(
            num_scalar_prefetch=0,
            grid=(2, nb),                                  # direction MUST stay outermost
            in_specs=[
                pl.BlockSpec((time_block, B, 4 * H), x_map),
                pl.BlockSpec((None, H, 4 * H), lambda d, t: (d, 0, 0)),
            ],
            out_specs=pl.BlockSpec((None, time_block, B, H), y_map),
            scratch_shapes=[
                pltpu.VMEM((B, H), jnp.float32),   # h carry (flushed once per time block)
                pltpu.VMEM((B, H), jnp.float32),   # c carry
            ],
        ),
        compiler_params=pltpu.CompilerParams(
            # direction axis is independent (both TCs on v7x); time is the recurrence.
            dimension_semantics=("parallel", "arbitrary"),
            vmem_limit_bytes=_VMEM_LIMIT_BYTES),
    )(x_proj, whh)


def bi_lstm_forward(tokens, params, num_layers):
    """Mirrors Bi_LSTM.forward: embed -> bidirectional multi-layer LSTM -> linear."""
    tok_tb = tokens.T                                   # inputs.permute(1, 0) -> (T, B)
    emb = params["embed"][tok_tb]                       # (T, B, E) embedding gather (XLA glue)
    T, B, E = emb.shape
    H = params["whh_l0"].shape[1]

    # Layer 0: hoisted batched input projection for both directions at once (bf16 slab).
    xp = run_matmul_bias(emb.reshape(T * B, E).astype(jnp.bfloat16),
                         params["wih_l0"], params["b_l0"],
                         out_dtype=jnp.bfloat16)                       # (T*B, 8H) bf16
    y = run_bilstm_layer(xp.reshape(T, B, 8 * H), params["whh_l0"])    # (2, T, B, H) bf16

    for l in range(1, num_layers):
        xp = run_dual_matmul_bias(y.reshape(2, T * B, H),
                                  params[f"wih_l{l}"], params[f"b_l{l}"],
                                  out_dtype=jnp.bfloat16)
        y = run_bilstm_layer(xp.reshape(T, B, 8 * H), params[f"whh_l{l}"])

    # encoding = cat(outputs[0], outputs[-1]) = [fwd_0, bwd_0, fwd_{T-1}, bwd_{T-1}]
    encoding = jnp.concatenate([y[0, 0], y[1, 0], y[0, -1], y[1, -1]], axis=-1)  # (B, 4H) bf16
    return run_matmul_bias(encoding, params["w_out"], params["b_out"])


# ---------------------------------------------------------------------------
# Pure-JAX reference (same math, same bf16 xp/y rounding) for correctness check
# ---------------------------------------------------------------------------
def bi_lstm_ref(tokens, params, num_layers):
    emb = params["embed"][tokens.T]
    T, B, E = emb.shape
    H = params["whh_l0"].shape[1]

    def run_dir(xp_dir, whh_dir):
        def step(carry, gp):
            h, c = carry
            gates = gp.astype(jnp.float32) + jnp.dot(h.astype(jnp.bfloat16), whh_dir,
                                                     preferred_element_type=jnp.float32)
            i_g = jax.nn.sigmoid(gates[:, 0 * H:1 * H])
            f_g = jax.nn.sigmoid(gates[:, 1 * H:2 * H])
            o_g = jax.nn.sigmoid(gates[:, 2 * H:3 * H])
            g_g = jnp.tanh(gates[:, 3 * H:4 * H])
            c = f_g * c + i_g * g_g
            h = o_g * jnp.tanh(c)
            return (h, c), h
        init = (jnp.zeros((B, H), jnp.float32), jnp.zeros((B, H), jnp.float32))
        _, ys = jax.lax.scan(step, init, xp_dir)
        return ys

    fwd = bwd = None
    for l in range(num_layers):
        if l == 0:
            xp = (jnp.dot(emb.reshape(T * B, E).astype(jnp.bfloat16), params["wih_l0"],
                          preferred_element_type=jnp.float32) + params["b_l0"])
        else:
            wih = params[f"wih_l{l}"]
            xp = (jnp.dot(fwd.astype(jnp.bfloat16).reshape(T * B, H), wih[0],
                          preferred_element_type=jnp.float32)
                  + jnp.dot(bwd.astype(jnp.bfloat16).reshape(T * B, H), wih[1],
                            preferred_element_type=jnp.float32)
                  + params[f"b_l{l}"])
        xp = xp.astype(jnp.bfloat16).reshape(T, B, 8 * H)   # mirror the kernel's bf16 xp storage
        whh = params[f"whh_l{l}"]
        fwd = run_dir(xp[..., :4 * H], whh[0])
        bwd = run_dir(xp[::-1, :, 4 * H:], whh[1])[::-1]

    encoding = jnp.concatenate([fwd[0], bwd[0], fwd[-1], bwd[-1]], axis=-1)
    return (jnp.dot(encoding.astype(jnp.bfloat16), params["w_out"],
                    preferred_element_type=jnp.float32) + params["b_out"])


# ---------------------------------------------------------------------------
# Deterministic parameter construction (synthetic; no checkpoint load)
# ---------------------------------------------------------------------------
def make_params(key, vocab_size, embed_dim, hidden, num_layers, output_dim):
    params = {}
    keys = jax.random.split(key, 1 + 3 * num_layers + 2)
    ki = iter(keys)
    scale = 0.1

    def normal(k, shape, dtype=jnp.float32):
        return (scale * jax.random.normal(k, shape, jnp.float32)).astype(dtype)

    params["embed"] = normal(next(ki), (vocab_size, embed_dim))
    for l in range(num_layers):
        # columns ordered [fwd gates i,f,o,g (4H) | bwd gates i,f,o,g (4H)]
        wih_shape = (embed_dim, 8 * hidden) if l == 0 else (2, hidden, 8 * hidden)
        params[f"wih_l{l}"] = normal(next(ki), wih_shape, jnp.bfloat16)
        params[f"whh_l{l}"] = normal(next(ki), (2, hidden, 4 * hidden), jnp.bfloat16)
        # bias_ih + bias_hh combined, concatenated over directions
        params[f"b_l{l}"] = normal(next(ki), (1, 8 * hidden))
    params["w_out"] = normal(next(ki), (4 * hidden, output_dim), jnp.bfloat16)
    params["b_out"] = normal(next(ki), (1, output_dim))
    return params


# ---------------------------------------------------------------------------
if __name__ == "__main__":
    VOCAB = 50
    EMBED = 16
    HIDDEN = 32
    LAYERS = 2
    OUT = 4
    BATCH = 2
    SEQ = 8

    key = jax.random.PRNGKey(0)
    k_par, k_tok = jax.random.split(key)
    params = make_params(k_par, VOCAB, EMBED, HIDDEN, LAYERS, OUT)
    tokens = jax.random.randint(k_tok, (BATCH, SEQ), 0, VOCAB, dtype=jnp.int32)

    out = jax.block_until_ready(bi_lstm_forward(tokens, params, LAYERS))
    assert out.shape == (BATCH, OUT), out.shape

    ref = jax.block_until_ready(bi_lstm_ref(tokens, params, LAYERS))
    np.testing.assert_allclose(np.asarray(out), np.asarray(ref), atol=1e-2, rtol=1e-2)

    print("KERNEL_OK")
</pallas_src>

<mosaic_0001>
module attributes {stable_mosaic.version = 11 : i64} {
  func.func @matmul_bias_kernel(%arg0: i32, %arg1: i32, %arg2: i32, %arg3: memref<16x16xbf16, #tpu.memory_space<vmem>>, %arg4: memref<16x256xbf16, #tpu.memory_space<vmem>>, %arg5: memref<1x256xf32, #tpu.memory_space<vmem>>, %arg6: memref<16x256xbf16, #tpu.memory_space<vmem>>, %arg7: memref<16x256xf32, #tpu.memory_space<vmem>>) attributes {dimension_semantics = [#tpu.dimension_semantics<parallel>, #tpu.dimension_semantics<parallel>, #tpu.dimension_semantics<arbitrary>], iteration_bounds = array<i64: 1, 1, 1>, scalar_prefetch = 0 : i64, scratch_operands = 1 : i64, tpu.core_type = #tpu.core_type<tc>, window_params = [{transform_indices = @transform_0, window_bounds = array<i64: 16, 16>}, {transform_indices = @transform_1, window_bounds = array<i64: 16, 256>}, {transform_indices = @transform_2, window_bounds = array<i64: 1, 256>}, {transform_indices = @transform_3, window_bounds = array<i64: 16, 256>}]} {
    %c0_i32 = arith.constant 0 : i32
    %0 = arith.cmpi eq, %arg2, %c0_i32 : i32
    %1 = arith.extui %0 : i1 to i32
    %c0_i32_0 = arith.constant 0 : i32
    %2 = arith.cmpi ne, %1, %c0_i32_0 : i32
    scf.if %2 {
      %cst_10 = arith.constant 0.000000e+00 : f32
      %12 = vector.broadcast %cst_10 : f32 to vector<16x256xf32>
      %c0_11 = arith.constant 0 : index
      %c0_12 = arith.constant 0 : index
      %13 = vector.load %arg7[%c0_11, %c0_12] : memref<16x256xf32, #tpu.memory_space<vmem>>, vector<16x256xf32>
      tpu.vector_store %arg7[%c0_11, %c0_12], %12 {strides = array<i32>} : memref<16x256xf32, #tpu.memory_space<vmem>>, vector<16x256xf32>,
    } else {
    }
    %c0 = arith.constant 0 : index
    %c0_1 = arith.constant 0 : index
    %3 = vector.load %arg7[%c0, %c0_1] : memref<16x256xf32, #tpu.memory_space<vmem>>, vector<16x256xf32>
    %c0_2 = arith.constant 0 : index
    %c0_3 = arith.constant 0 : index
    %4 = vector.load %arg3[%c0_2, %c0_3] : memref<16x16xbf16, #tpu.memory_space<vmem>>, vector<16x16xbf16>
    %c0_4 = arith.constant 0 : index
    %c0_5 = arith.constant 0 : index
    %5 = vector.load %arg4[%c0_4, %c0_5] : memref<16x256xbf16, #tpu.memory_space<vmem>>, vector<16x256xbf16>
    %cst = arith.constant dense<0.000000e+00> : vector<16x256xf32>
    %6 = tpu.matmul %4, %5, %cst {dimension_numbers = #tpu.dot_dimension_numbers<[1], [0], [0], [1], [0, 0, 1, 1], [], []>} : vector<16x16xbf16>, vector<16x256xbf16>, vector<16x256xf32> -> vector<16x256xf32>
    %7 = arith.addf %3, %6 : vector<16x256xf32>
    %c0_6 = arith.constant 0 : index
    %c0_7 = arith.constant 0 : index
    %8 = vector.load %arg7[%c0_6, %c0_7] : memref<16x256xf32, #tpu.memory_space<vmem>>, vector<16x256xf32>
    tpu.vector_store %arg7[%c0_6, %c0_7], %7 {strides = array<i32>} : memref<16x256xf32, #tpu.memory_space<vmem>>, vector<16x256xf32>,
    %c0_i32_8 = arith.constant 0 : i32
    %9 = arith.cmpi eq, %arg2, %c0_i32_8 : i32
    %10 = arith.extui %9 : i1 to i32
    %c0_i32_9 = arith.constant 0 : i32
    %11 = arith.cmpi ne, %10, %c0_i32_9 : i32
    scf.if %11 {
      %c0_10 = arith.constant 0 : index
      %c0_11 = arith.constant 0 : index
      %12 = vector.load %arg7[%c0_10, %c0_11] : memref<16x256xf32, #tpu.memory_space<vmem>>, vector<16x256xf32>
      %c0_12 = arith.constant 0 : index
      %c0_13 = arith.constant 0 : index
      %13 = vector.load %arg5[%c0_12, %c0_13] : memref<1x256xf32, #tpu.memory_space<vmem>>, vector<1x256xf32>
      %14 = vector.broadcast %13 : vector<1x256xf32> to vector<16x256xf32>
      %15 = arith.addf %12, %14 : vector<16x256xf32>
      %16 = arith.truncf %15 : vector<16x256xf32> to vector<16x256xbf16>
      %c0_14 = arith.constant 0 : index
      %c0_15 = arith.constant 0 : index
      %17 = vector.load %arg6[%c0_14, %c0_15] : memref<16x256xbf16, #tpu.memory_space<vmem>>, vector<16x256xbf16>
      tpu.vector_store %arg6[%c0_14, %c0_15], %16 {strides = array<i32>} : memref<16x256xbf16, #tpu.memory_space<vmem>>, vector<16x256xbf16>,
    } else {
    }
    return
  }
  func.func @transform_0(%arg0: i32, %arg1: i32, %arg2: i32) -> (i32, i32) {
    %c0_i32 = arith.constant 0 : i32
    return %arg0, %arg2 : i32, i32
  }
  func.func @transform_1(%arg0: i32, %arg1: i32, %arg2: i32) -> (i32, i32) {
    %c0_i32 = arith.constant 0 : i32
    return %arg2, %arg1 : i32, i32
  }
  func.func @transform_2(%arg0: i32, %arg1: i32, %arg2: i32) -> (i32, i32) {
    %c0_i32 = arith.constant 0 : i32
    %c0_i32_0 = arith.constant 0 : i32
    return %c0_i32, %arg1 : i32, i32
  }
  func.func @transform_3(%arg0: i32, %arg1: i32, %arg2: i32) -> (i32, i32) {
    %c0_i32 = arith.constant 0 : i32
    return %arg0, %arg1 : i32, i32
  }
}

</mosaic_0001>

<bundles_post_ra>
// kernel: tpu_custom_call.1
= control target key start
LH: loop header
LB: loop body
LE: loop exit
PB: predicated region body
PF: predicated region fallthrough
CT: control target
= control target key end

     0   :  { %8 = vsyncpa [#allocation4], 0  ;;  %s350_s0 = inlined_call_operand.hbm [shape: bf16[16,16], index: 0, kind: input, shape index: {}]   ;;  %s351_s1 = inlined_call_operand.hbm [shape: bf16[16,256], index: 1, kind: input, shape index: {}]   ;;  %s352_s2 = inlined_call_operand.vmem [shape: f32[1,256], index: 2, kind: input, shape index: {}]   ;;  %s353_s3 = inlined_call_operand.hbm [shape: bf16[16,256], index: 3, kind: output, shape index: {}]  }
   0x1   :  { %9 = vsyncpa [#allocation7], 0 }
   0x2   :  { %10 = vsyncpa [#allocation5], 0  ;;  %s277_s12 = smov [#allocation3]   ;;  %s205_s16 = scalar_lea.hbm %s350_s0, 128 }
   0x3   :  { %s16_s13 = sshll.u32 %s277_s12, 4  ;;  %p206_p0 = scmp.ne.s32.totalorder %s350_s0, %s205_s16  ;;  %s17_s13 = int_to_ptr.vmem [resolvable:$true] %s16_s13 }
   0x4   :  { %p209_p1 = scmp.lt.u32.totalorder %s205_s16, %s350_s0 }
   0x6   :  { %p211_p2 = pnand %p209_p1, %p206_p0 }
   0x8   :  { %214 = shalt.err (!%p211_p2)
}
   0x9   :  { %s215_s21 = scalar_lea.vmem %s17_s13, 128  ;;  %p220_p4 = scmp.lt.s32.totalorder %s17_s13, %s17_s13 }
   0xa   :  { %p216_p3 = scmp.ne.s32.totalorder %s17_s13, %s215_s21  ;;  %p221_p5 = scmp.lt.s32.totalorder %s215_s21, %s215_s21 }
   0xc   :  { %p222_p6 = por %p221_p5, %p220_p4 }
   0xe   :  { %p223_p7 = pnand %p222_p6, %p216_p3 }
  0x10   :  { %226 = shalt.err (!%p223_p7)
}
  0x11   :  { %s278_s22 = smov 64   ;;  %s279_s23 = smov 4  }
  0x12   :  { %22 = dma.hbm_to_vmem [thread:$0]  %s350_s0, 128, %s17_s13, [#allocation4], %s278_s22, %s278_s22, %s279_s23  }
  0x13   :  { %s280_s26 = smov [#allocation6]   ;;  %s227_s30 = scalar_lea.hbm %s351_s1, 256 }
  0x14   :  { %s28_s27 = sshll.u32 %s280_s26, 4  ;;  %p228_p8 = scmp.ne.s32.totalorder %s351_s1, %s227_s30  ;;  %s29_s27 = int_to_ptr.vmem [resolvable:$true] %s28_s27 }
  0x15   :  { %p231_p9 = scmp.lt.u32.totalorder %s227_s30, %s351_s1 }
  0x17   :  { %p233_p10 = pnand %p231_p9, %p228_p8 }
  0x19   :  { %236 = shalt.err (!%p233_p10)
}
  0x1a   :  { %s237_s8 = scalar_lea.vmem %s29_s27, 256  ;;  %p242_p12 = scmp.lt.s32.totalorder %s29_s27, %s29_s27 }
  0x1b   :  { %p238_p11 = scmp.ne.s32.totalorder %s29_s27, %s237_s8  ;;  %p243_p13 = scmp.lt.s32.totalorder %s237_s8, %s237_s8 }
  0x1d   :  { %p244_p0 = por %p243_p13, %p242_p12 }
  0x1f   :  { %p245_p1 = pnand %p244_p0, %p238_p11 }
  0x21   :  { %248 = shalt.err (!%p245_p1)
}
  0x22   :  { %s281_s0 = smov 128   ;;  %s282_s9 = smov 8  }
  0x23   :  { %34 = dma.hbm_to_vmem [thread:$0]  %s351_s1, 256, %s29_s27, [#allocation7], %s281_s0, %s281_s0, %s282_s9  }
  0x24   :  { %271 = dma.done.wait [#allocation4], 128  }
  0x25   :  { %272 = vsyncadd [#allocation4], 4294967168 }
  0x26   :  { %273 = dma.done.wait [#allocation7], 256  }
  0x27   :  { %274 = vsyncadd [#allocation7], 4294967040  ;;  %v283_v0 = vmov 0   ;;  %v201_v1 = vld [vmem:[#allocation6 + $0x4] ss:$8 sps:$4 sm:$0xff]   ;;  %v204_v3 = vld [vmem:[#allocation3] sm:$0xff]   ;;  %v139_v4 = vlaneseq }
  0x28   :  { %111 = vmatprep.mubr.bf16.mxu0 %v283_v0  ;;  %v203_v2 = vld [vmem:[#allocation6] ss:$8 sps:$4 sm:$0xff]   ;;  %79 = vmatprep.subr.bf16.mxu0 %v201_v1  ;;  %vm75_vm0 = vcmask 130048   ;;  %v137_v7 = vld [vmem:[%s352_s2] sm:$0x3]  ;;  %s284_s1 = smov [#allocation8]  }
  0x29   :  { %80 = vmatpush1.bf16.msra.mxu0 %v203_v2  ;;  %v140_v5 = vshrl.u32 %v139_v4, 7  ;;  %s172_s14 = sshll.u32 %s284_s1, 4  ;;  %s173_s14 = int_to_ptr.vmem [resolvable:$true] %s172_s14 }
  0x2a   :  { %s249_s15 = scalar_lea.vmem %s173_s14, 256  ;;  %p254_p3 = scmp.lt.s32.totalorder %s173_s14, %s173_s14 }
  0x2b   :  { %v141_v6 = vsub.s32 0, %v140_v5  ;;  %v145_v8 = vsub.s32 1, %v140_v5  ;;  %p250_p2 = scmp.ne.s32.totalorder %s173_s14, %s249_s15  ;;  %p255_p4 = scmp.lt.s32.totalorder %s249_s15, %s249_s15 }
  0x2c   :  { %188 = vmatmul.mubr.msk.bf16.vlgmr.msra.gmra.mrb[0].mxu0 %vm75_vm0, %v204_v3 }
  0x2d   :  { %v142_v9 = vrot.slane %v137_v7, %v141_v6  ;;  %v146_v10 = vrot.slane %v137_v7, %v145_v8  ;;  %p256_p5 = por %p255_p4, %p254_p3 }
  0x2f   :  { %p257_p6 = pnand %p256_p5, %p250_p2 }
  0xff   :  { %v113_v11 = vpop.f32.mrb[0].mxu0 }
 0x100   :  { %v149_v12 = vadd.f32 %v142_v9, %v113_v11  ;;  %v115_v13 = vpop.f32.mrb[1].mxu0 }
 0x101   :  { %v150_v14 = vadd.f32 %v146_v10, %v115_v13  ;;  %v117_v15 = vpop.f32.mrb[2].mxu0 }
 0x102   :  { %v151_v16 = vadd.f32 %v142_v9, %v117_v15  ;;  %v119_v17 = vpop.f32.mrb[3].mxu0 }
 0x103   :  { %v191_v18 = vpack.c.bf16 %v150_v14, %v149_v12  ;;  %v152_v19 = vadd.f32 %v146_v10, %v119_v17 }
 0x105   :  { %165 = vst [vmem:[#allocation8] sm:$0xff] %v191_v18  ;;  %v192_v20 = vpack.c.bf16 %v152_v19, %v151_v16 }
 0x107   :  { %166 = vst [vmem:[#allocation8 + $0x8] sm:$0xff] %v192_v20 }
 0x108   :  { %260 = shalt.err (!%p257_p6)
}
 0x109   :  { %s261_s17 = scalar_lea.hbm %s353_s3, 256 }
 0x10a   :  { %p262_p7 = scmp.ne.s32.totalorder %s353_s3, %s261_s17  ;;  %p265_p8 = scmp.lt.u32.totalorder %s261_s17, %s353_s3 }
 0x10c   :  { %p267_p9 = pnand %p265_p8, %p262_p7 }
 0x10e   :  { %270 = shalt.err (!%p267_p9)
}
 0x10f   :  { %178 = dma.vmem_to_hbm [thread:$0]  %s173_s14, 256, %s353_s3, [#allocation5], %s281_s0, %s281_s0, %s282_s9  }
 0x110   :  { %275 = dma.done.wait [#allocation5], 256  }
 0x111   :  { %276 = vsyncadd [#allocation5], 4294967040 }
 0x112   :  { %182 = vsyncpa [#allocation4], 1 }
 0x113   :  { %183 = vsyncpa [#allocation7], 1 }
 0x114   :  { %184 = vsyncpa [#allocation5], 1 }

</bundles_post_ra>
